<compile_context>
chip_gen: v7x
topology: tpu7x:2x2x1
jax: 0.10.0
libtpu: 0.0.40
codegen_flags: <defaults>
</compile_context>

<pallas_src>
import functools

import jax
import jax.numpy as jnp
from jax.experimental import pallas as pl
from jax.experimental.pallas import tpu as pltpu


def _qrp_kernel(scale_ref, x_ref, w_ref, bias_ref, o_ref, acc_ref, *, compute_dtype):
    """One (tm, tn) output tile, reduced over the K grid axis.

    scale_ref : SMEM (1,)      float32   scalar quantization scale
    x_ref     : VMEM (tm, tk)  activation tile (input dtype)
    w_ref     : VMEM (tk, tn)  int8 weight tile, already in (K, N) layout
    bias_ref  : VMEM (1, tn)   float32 bias slice
    o_ref     : VMEM (tm, tn)  output tile (input dtype)
    acc_ref   : VMEM (tm, tn)  float32 accumulator scratch
    """
    k = pl.program_id(2)

    @pl.when(k == 0)
    def _init():
        acc_ref[...] = jnp.zeros_like(acc_ref)

    # int8 -> bf16 cast is exact; the scalar scale is deferred to finalize so
    # dequant costs O(M*N) once instead of O(N*K) per grid step.
    acc_ref[...] += jnp.dot(
        x_ref[...].astype(compute_dtype),
        w_ref[...].astype(compute_dtype),
        preferred_element_type=jnp.float32,
    )

    @pl.when(k == pl.num_programs(2) - 1)
    def _finalize():
        scale = scale_ref[0]  # single SMEM read per output tile
        out = acc_ref[...] * scale + bias_ref[...]
        o_ref[...] = out.astype(o_ref.dtype)


def _pick_tile(dim, preferred, align):
    """Full dim if small; else the largest multiple of `align` <= preferred that
    divides `dim`; falls back to the full dim (exact division keeps the grid
    free of padding/edge-block handling)."""
    if dim <= preferred:
        return dim
    t = (preferred // align) * align
    while t >= align:
        if dim % t == 0:
            return t
        t -= align
    return dim


def quantized_row_parallel_forward(
    x, weight_q, scale, bias=None, *,
    tm=256, tn=512, tk=1024, compute_dtype=jnp.bfloat16,
):
    """x: [B, S, K] (f32/bf16); weight_q: [N, K] int8; scale: [1] f32; bias: [N]."""
    B, S, K = x.shape
    N, K_w = weight_q.shape
    assert K == K_w, "input hidden dim must match weight's per-partition input dim"
    M = B * S

    x2d = x.reshape(M, K)

    # One-time layout change (in a real deployment done once at checkpoint
    # load): store the int8 weight as (K, N) so each tile feeds the MXU
    # lane-dense along N with a plain MN contraction.
    w_kn = weight_q.T

    if bias is None:
        bias = jnp.zeros((N,), dtype=jnp.float32)
    # Bias participates in the f32 epilogue; pass it as f32 so the kernel does
    # not re-cast it per output tile.
    bias2d = bias.reshape(1, N).astype(jnp.float32)

    # Tile selection: full-extent for small dims (satisfies the (8,128) rule),
    # aligned divisors otherwise.  Defaults sized for v7x's 64 MiB VMEM; they
    # are also fine (conservative) on v5e/v6e's 128 MiB.
    tm = _pick_tile(M, tm, 8)
    tn = _pick_tile(N, tn, 128)
    tk = _pick_tile(K, tk, 128)
    grid = (M // tm, N // tn, K // tk)

    kernel = functools.partial(_qrp_kernel, compute_dtype=compute_dtype)

    bytes_accessed = (
        M * K * x.dtype.itemsize          # activations
        + N * K * 1                       # int8 weight
        + N * 4                           # bias
        + M * N * x.dtype.itemsize        # output
    )
    cost = pl.CostEstimate(
        flops=2 * M * N * K, transcendentals=0, bytes_accessed=bytes_accessed
    )

    out2d = pl.pallas_call(
        kernel,
        out_shape=jax.ShapeDtypeStruct((M, N), x.dtype),
        grid_spec=pltpu.PrefetchScalarGridSpec(
            num_scalar_prefetch=0,
            grid=grid,
            in_specs=[
                # scalar quantization scale lives in SMEM
                pl.BlockSpec(memory_space=pltpu.MemorySpace.SMEM),
                pl.BlockSpec((tm, tk), lambda i, j, k: (i, k)),   # activations
                pl.BlockSpec((tk, tn), lambda i, j, k: (k, j)),   # int8 weight (K,N)
                pl.BlockSpec((1, tn), lambda i, j, k: (0, j)),    # bias slice
            ],
            out_specs=pl.BlockSpec((tm, tn), lambda i, j, k: (i, j)),
            scratch_shapes=[pltpu.VMEM((tm, tn), jnp.float32)],
        ),
        compiler_params=pltpu.CompilerParams(
            dimension_semantics=("parallel", "parallel", "arbitrary"),
            vmem_limit_bytes=48 * 1024 * 1024,
        ),
        cost_estimate=cost,
    )(scale.astype(jnp.float32), x2d, w_kn, bias2d)

    # TODO(synk): scatter_to_tensor_model_parallel_region /
    # reduce_from_tensor_model_parallel_region are identities here because the
    # tensor-parallel world_size == 1 in this synthetic setup.
    return out2d.reshape(B, S, N)


def _reference(x, weight_q, scale, bias, compute_dtype=jnp.float32):
    w = weight_q.astype(compute_dtype)
    out = jnp.einsum(
        "bsk,nk->bsn", x.astype(compute_dtype), w,
        preferred_element_type=jnp.float32,
    )
    return out * scale.astype(jnp.float32)[0] + bias.astype(jnp.float32)


if __name__ == "__main__":
    # Module config (world_size = 1): input_size = 32, output_size = 32,
    # bias=True, dequantized dtype = float32, quantized_dtype = int8.
    batch, seq, hidden_in, hidden_out = 2, 8, 32, 32

    key = jax.random.PRNGKey(0)
    kx, kw, kb = jax.random.split(key, 3)

    x = jax.random.normal(kx, (batch, seq, hidden_in), dtype=jnp.float32)
    # Deterministic synthetic int8 weight (the real module zero-inits and loads a ckpt).
    weight_q = jax.random.randint(
        kw, (hidden_out, hidden_in), -128, 128, dtype=jnp.int32
    ).astype(jnp.int8)
    scale = jnp.array([0.05], dtype=jnp.float32)
    bias = jax.random.normal(kb, (hidden_out,), dtype=jnp.float32)

    out = quantized_row_parallel_forward(x, weight_q, scale, bias)
    out = jax.block_until_ready(out)
    assert out.shape == (batch, seq, hidden_out)

    # Primary check: same mixed precision as the kernel (bf16 MXU, f32 accumulate).
    ref_mixed = _reference(x, weight_q, scale, bias, compute_dtype=jnp.bfloat16)
    assert jnp.allclose(out, ref_mixed, atol=1e-3, rtol=1e-3), \
        "mismatch vs mixed-precision reference"

    # Sanity check vs full-f32 module semantics (loose tolerance only covers the
    # standard bf16 activation cast for the MXU; int8 weights are exact in bf16).
    ref_f32 = _reference(x, weight_q, scale, bias, compute_dtype=jnp.float32)
    assert jnp.allclose(out, ref_f32, atol=0.25, rtol=0.05), \
        "mismatch vs f32 reference"

    print("KERNEL_OK")
</pallas_src>

<mosaic_0001>
module attributes {stable_mosaic.version = 11 : i64} {
  func.func @_qrp_kernel(%arg0: i32, %arg1: i32, %arg2: i32, %arg3: memref<1xf32, #tpu.memory_space<smem>>, %arg4: memref<16x32xf32, #tpu.memory_space<vmem>>, %arg5: memref<32x32xi8, #tpu.memory_space<vmem>>, %arg6: memref<1x32xf32, #tpu.memory_space<vmem>>, %arg7: memref<16x32xf32, #tpu.memory_space<vmem>>, %arg8: memref<16x32xf32, #tpu.memory_space<vmem>>) attributes {dimension_semantics = [#tpu.dimension_semantics<parallel>, #tpu.dimension_semantics<parallel>, #tpu.dimension_semantics<arbitrary>], iteration_bounds = array<i64: 1, 1, 1>, scalar_prefetch = 0 : i64, scratch_operands = 1 : i64, tpu.core_type = #tpu.core_type<tc>, window_params = [{transform_indices = @transform_0, window_bounds = array<i64: 1>}, {transform_indices = @transform_1, window_bounds = array<i64: 16, 32>}, {transform_indices = @transform_2, window_bounds = array<i64: 32, 32>}, {transform_indices = @transform_3, window_bounds = array<i64: 1, 32>}, {transform_indices = @transform_4, window_bounds = array<i64: 16, 32>}]} {
    %c0_i32 = arith.constant 0 : i32
    %0 = arith.cmpi eq, %arg2, %c0_i32 : i32
    %1 = arith.extui %0 : i1 to i32
    %c0_i32_0 = arith.constant 0 : i32
    %2 = arith.cmpi ne, %1, %c0_i32_0 : i32
    scf.if %2 {
      %cst_10 = arith.constant 0.000000e+00 : f32
      %14 = vector.broadcast %cst_10 : f32 to vector<16x32xf32>
      %c0_11 = arith.constant 0 : index
      %c0_12 = arith.constant 0 : index
      %15 = vector.load %arg8[%c0_11, %c0_12] : memref<16x32xf32, #tpu.memory_space<vmem>>, vector<16x32xf32>
      tpu.vector_store %arg8[%c0_11, %c0_12], %14 {strides = array<i32>} : memref<16x32xf32, #tpu.memory_space<vmem>>, vector<16x32xf32>,
    } else {
    }
    %c0 = arith.constant 0 : index
    %c0_1 = arith.constant 0 : index
    %3 = vector.load %arg8[%c0, %c0_1] : memref<16x32xf32, #tpu.memory_space<vmem>>, vector<16x32xf32>
    %c0_2 = arith.constant 0 : index
    %c0_3 = arith.constant 0 : index
    %4 = vector.load %arg4[%c0_2, %c0_3] : memref<16x32xf32, #tpu.memory_space<vmem>>, vector<16x32xf32>
    %5 = arith.truncf %4 : vector<16x32xf32> to vector<16x32xbf16>
    %c0_4 = arith.constant 0 : index
    %c0_5 = arith.constant 0 : index
    %6 = vector.load %arg5[%c0_4, %c0_5] : memref<32x32xi8, #tpu.memory_space<vmem>>, vector<32x32xi8>
    %7 = arith.sitofp %6 : vector<32x32xi8> to vector<32x32xbf16>
    %cst = arith.constant dense<0.000000e+00> : vector<16x32xf32>
    %8 = tpu.matmul %5, %7, %cst {dimension_numbers = #tpu.dot_dimension_numbers<[1], [0], [0], [1], [0, 0, 1, 1], [], []>} : vector<16x32xbf16>, vector<32x32xbf16>, vector<16x32xf32> -> vector<16x32xf32>
    %9 = arith.addf %3, %8 : vector<16x32xf32>
    %c0_6 = arith.constant 0 : index
    %c0_7 = arith.constant 0 : index
    %10 = vector.load %arg8[%c0_6, %c0_7] : memref<16x32xf32, #tpu.memory_space<vmem>>, vector<16x32xf32>
    tpu.vector_store %arg8[%c0_6, %c0_7], %9 {strides = array<i32>} : memref<16x32xf32, #tpu.memory_space<vmem>>, vector<16x32xf32>,
    %c0_i32_8 = arith.constant 0 : i32
    %11 = arith.cmpi eq, %arg2, %c0_i32_8 : i32
    %12 = arith.extui %11 : i1 to i32
    %c0_i32_9 = arith.constant 0 : i32
    %13 = arith.cmpi ne, %12, %c0_i32_9 : i32
    scf.if %13 {
      %c0_10 = arith.constant 0 : index
      %14 = memref.load %arg3[%c0_10] : memref<1xf32, #tpu.memory_space<smem>>
      %c0_11 = arith.constant 0 : index
      %c0_12 = arith.constant 0 : index
      %15 = vector.load %arg8[%c0_11, %c0_12] : memref<16x32xf32, #tpu.memory_space<vmem>>, vector<16x32xf32>
      %16 = vector.broadcast %14 : f32 to vector<16x32xf32>
      %17 = arith.mulf %15, %16 : vector<16x32xf32>
      %c0_13 = arith.constant 0 : index
      %c0_14 = arith.constant 0 : index
      %18 = vector.load %arg6[%c0_13, %c0_14] : memref<1x32xf32, #tpu.memory_space<vmem>>, vector<1x32xf32>
      %19 = vector.broadcast %18 : vector<1x32xf32> to vector<16x32xf32>
      %20 = arith.addf %17, %19 : vector<16x32xf32>
      %c0_15 = arith.constant 0 : index
      %c0_16 = arith.constant 0 : index
      %21 = vector.load %arg7[%c0_15, %c0_16] : memref<16x32xf32, #tpu.memory_space<vmem>>, vector<16x32xf32>
      tpu.vector_store %arg7[%c0_15, %c0_16], %20 {strides = array<i32>} : memref<16x32xf32, #tpu.memory_space<vmem>>, vector<16x32xf32>,
    } else {
    }
    return
  }
  func.func @transform_0(%arg0: i32, %arg1: i32, %arg2: i32) -> i32 {
    %c0_i32 = arith.constant 0 : i32
    %c0_i32_0 = arith.constant 0 : i32
    return %c0_i32 : i32
  }
  func.func @transform_1(%arg0: i32, %arg1: i32, %arg2: i32) -> (i32, i32) {
    %c0_i32 = arith.constant 0 : i32
    return %arg0, %arg2 : i32, i32
  }
  func.func @transform_2(%arg0: i32, %arg1: i32, %arg2: i32) -> (i32, i32) {
    %c0_i32 = arith.constant 0 : i32
    return %arg2, %arg1 : i32, i32
  }
  func.func @transform_3(%arg0: i32, %arg1: i32, %arg2: i32) -> (i32, i32) {
    %c0_i32 = arith.constant 0 : i32
    %c0_i32_0 = arith.constant 0 : i32
    return %c0_i32, %arg1 : i32, i32
  }
  func.func @transform_4(%arg0: i32, %arg1: i32, %arg2: i32) -> (i32, i32) {
    %c0_i32 = arith.constant 0 : i32
    return %arg0, %arg1 : i32, i32
  }
}

</mosaic_0001>

<bundles_post_ra>
// kernel: tpu_custom_call.1
= control target key start
LH: loop header
LB: loop body
LE: loop exit
PB: predicated region body
PF: predicated region fallthrough
CT: control target
= control target key end

     0   :  { %10 = vsyncpa [#allocation5], 0  ;;  %s327_s0 = inlined_call_operand.<no memory space> [shape: f32[1], index: 0, kind: input, shape index: {}]   ;;  %s328_s1 = inlined_call_operand.hbm [shape: f32[16,32], index: 1, kind: input, shape index: {}]   ;;  %s329_s2 = inlined_call_operand.hbm [shape: s8[32,32], index: 2, kind: input, shape index: {}]   ;;  %s330_s3 = inlined_call_operand.vmem [shape: f32[1,32], index: 3, kind: input, shape index: {}]   ;;  %s331_s4 = inlined_call_operand.hbm [shape: f32[16,32], index: 4, kind: output, shape index: {}]  }
   0x1   :  { %11 = vsyncpa [#allocation8], 0 }
   0x2   :  { %12 = vsyncpa [#allocation6], 0  ;;  %s240_s15 = smov [#allocation4]   ;;  %s168_s19 = scalar_lea.hbm %s328_s1, 256 }
   0x3   :  { %s20_s16 = sshll.u32 %s240_s15, 4  ;;  %p169_p0 = scmp.ne.s32.totalorder %s328_s1, %s168_s19  ;;  %s21_s16 = int_to_ptr.vmem [resolvable:$true] %s20_s16 }
   0x4   :  { %p172_p1 = scmp.lt.u32.totalorder %s168_s19, %s328_s1 }
   0x6   :  { %p174_p2 = pnand %p172_p1, %p169_p0 }
   0x8   :  { %177 = shalt.err (!%p174_p2)
}
   0x9   :  { %s178_s24 = scalar_lea.vmem %s21_s16, 256  ;;  %p183_p4 = scmp.lt.s32.totalorder %s21_s16, %s21_s16 }
   0xa   :  { %p179_p3 = scmp.ne.s32.totalorder %s21_s16, %s178_s24  ;;  %p184_p5 = scmp.lt.s32.totalorder %s178_s24, %s178_s24 }
   0xc   :  { %p185_p6 = por %p184_p5, %p183_p4 }
   0xe   :  { %p186_p7 = pnand %p185_p6, %p179_p3 }
  0x10   :  { %189 = shalt.err (!%p186_p7)
}
  0x11   :  { %s241_s25 = smov 128   ;;  %s242_s26 = smov 8  }
  0x12   :  { %26 = dma.hbm_to_vmem [thread:$0]  %s328_s1, 256, %s21_s16, [#allocation5], %s241_s25, %s241_s25, %s242_s26  }
  0x13   :  { %s243_s29 = smov [#allocation7]   ;;  %s190_s7 = scalar_lea.hbm %s329_s2, 128 }
  0x14   :  { %s33_s30 = sshll.u32 %s243_s29, 4  ;;  %p191_p8 = scmp.ne.s32.totalorder %s329_s2, %s190_s7  ;;  %s34_s30 = int_to_ptr.vmem [resolvable:$true] %s33_s30 }
  0x15   :  { %p194_p9 = scmp.lt.u32.totalorder %s190_s7, %s329_s2 }
  0x17   :  { %p196_p10 = pnand %p194_p9, %p191_p8 }
  0x19   :  { %199 = shalt.err (!%p196_p10)
}
  0x1a   :  { %s200_s12 = scalar_lea.vmem %s34_s30, 128  ;;  %p205_p12 = scmp.lt.s32.totalorder %s34_s30, %s34_s30 }
  0x1b   :  { %p201_p11 = scmp.ne.s32.totalorder %s34_s30, %s200_s12  ;;  %p206_p13 = scmp.lt.s32.totalorder %s200_s12, %s200_s12 }
  0x1d   :  { %p207_p0 = por %p206_p13, %p205_p12 }
  0x1f   :  { %p208_p1 = pnand %p207_p0, %p201_p11 }
  0x21   :  { %211 = shalt.err (!%p208_p1)
}
  0x22   :  { %36 = dma.hbm_to_vmem [thread:$0]  %s329_s2, 128, %s34_s30, [#allocation8]  }
  0x23   :  { %234 = dma.done.wait [#allocation5], 256  }
  0x24   :  { %235 = vsyncadd [#allocation5], 4294967040 }
  0x25   :  { %236 = dma.done.wait [#allocation8], 128  }
  0x26   :  { %237 = vsyncadd [#allocation8], 4294967168  ;;  %vm50_vm0 = vcmask 261120   ;;  %v244_v0 = vmov 0.0   ;;  %vm245_vm1 = vmmov 0   ;;  %v58_v1 = vld [vmem:[#allocation7] sm:$0xff]  ;;  %v116_v15 = vstv %s327_s0 }
  0x27   :  { %153 = vmatprep.subr.bf16.mxu0 %v244_v0  ;;  %157 = vmatprep.mubr.msk.bf16.mxu0 %vm245_vm1, %v244_v0  ;;  %51 = vst.msk [vmem:[#allocation2] sm:$0xff] %vm50_vm0, %v244_v0  ;;  %52 = vst.msk [vmem:[#allocation2 + $0x8] sm:$0xff] %vm50_vm0, %v244_v0  ;;  %v59_v2 = vunpack.c.l.s8.bf16 %v58_v1  ;;  %v60_v3 = vunpack.c.h.s8.bf16 %v58_v1  ;;  %v55_v4 = vld [vmem:[#allocation4] sm:$0xff]  ;;  %v56_v5 = vld [vmem:[#allocation4 + $0x8] sm:$0xff]  ;;  %s246_s17 = smov [#allocation9]  }
  0x28   :  { %v57_v6 = vpack.c.bf16 %v56_v5, %v55_v4  ;;  %v149_v17 = vld [vmem:[%s330_s3] ss:$0 sm:$0xff]  ;;  %s135_s18 = sshll.u32 %s246_s17, 4  ;;  %s136_s18 = int_to_ptr.vmem [resolvable:$true] %s135_s18 }
  0x29   :  { %154 = vmatpush3.bf16.msra.mxu0 %v59_v2  ;;  %s212_s19 = scalar_lea.vmem %s136_s18, 256  ;;  %p217_p3 = scmp.lt.s32.totalorder %s136_s18, %s136_s18 }
  0x2a   :  { %155 = vmatprep.subr.bf16.mxu0 %v244_v0  ;;  %p213_p2 = scmp.ne.s32.totalorder %s136_s18, %s212_s19  ;;  %p218_p4 = scmp.lt.s32.totalorder %s212_s19, %s212_s19 }
  0x2c   :  { %p219_p5 = por %p218_p4, %p217_p3 }
  0x2d   :  { %156 = vmatpush3.bf16.msra.mxu0 %v60_v3 }
  0x2e   :  { %v53_v7 = vld [vmem:[#allocation2] sm:$0xff]  ;;  %v54_v9 = vld [vmem:[#allocation2 + $0x8] sm:$0xff]  ;;  %p220_p6 = pnand %p219_p5, %p213_p2 }
  0x30   :  { %158 = vmatmul.mubr.msk.bf16.vlgmr.msra.gmra.mrb[0].mxu0 %vm50_vm0, %v57_v6 }
 0x103   :  { %v99_v8 = vpop.f32.mrb[0].mxu0 }
 0x104   :  { %v106_v10 = vadd.f32 %v99_v8, %v53_v7  ;;  %v159_v11 = vpop.f32.mrb[1].mxu0 }
 0x105   :  { %v102_v12 = vpop.f32.mrb[2].mxu0 }
 0x106   :  { %108 = vst.msk [vmem:[#allocation2] sm:$0xff] %vm50_vm0, %v106_v10  ;;  %v107_v13 = vadd.f32 %v102_v12, %v54_v9  ;;  %v160_v14 = vpop.f32.mrb[3].mxu0 }
 0x108   :  { %109 = vst.msk [vmem:[#allocation2 + $0x8] sm:$0xff] %vm50_vm0, %v107_v13 }
 0x10d   :  { %v114_v16 = vld [vmem:[#allocation2] sm:$0xff] }
 0x10e   :  { %v117_v18 = vmul.f32 %v116_v15, %v114_v16 }
 0x10f   :  { %v115_v19 = vld [vmem:[#allocation2 + $0x8] sm:$0xff] }
 0x110   :  { %v118_v20 = vmul.f32 %v116_v15, %v115_v19  ;;  %v126_v21 = vadd.f32 %v149_v17, %v117_v18 }
 0x112   :  { %v127_v22 = vadd.f32 %v149_v17, %v118_v20  ;;  %128 = vst.msk [vmem:[#allocation9] sm:$0xff] %vm50_vm0, %v126_v21 }
 0x114   :  { %129 = vst.msk [vmem:[#allocation9 + $0x8] sm:$0xff] %vm50_vm0, %v127_v22 }
 0x115   :  { %223 = shalt.err (!%p220_p6)
}
 0x116   :  { %s224_s20 = scalar_lea.hbm %s331_s4, 256 }
 0x117   :  { %p225_p7 = scmp.ne.s32.totalorder %s331_s4, %s224_s20  ;;  %p228_p8 = scmp.lt.u32.totalorder %s224_s20, %s331_s4 }
 0x119   :  { %p230_p9 = pnand %p228_p8, %p225_p7 }
 0x11b   :  { %233 = shalt.err (!%p230_p9)
}
 0x11c   :  { %141 = dma.vmem_to_hbm [thread:$0]  %s136_s18, 256, %s331_s4, [#allocation6], %s241_s25, %s241_s25, %s242_s26  }
 0x11d   :  { %238 = dma.done.wait [#allocation6], 256  }
 0x11e   :  { %239 = vsyncadd [#allocation6], 4294967040 }
 0x11f   :  { %145 = vsyncpa [#allocation5], 1 }
 0x120   :  { %146 = vsyncpa [#allocation8], 1 }
 0x121   :  { %147 = vsyncpa [#allocation6], 1 }

</bundles_post_ra>
